<compile_context>
chip_gen: v7x
topology: tpu7x:2x2x1
jax: 0.10.0
libtpu: 0.0.40
codegen_flags: <defaults>
</compile_context>

<pallas_src>
import jax
import jax.numpy as jnp
from jax.experimental import pallas as pl
from jax.experimental.pallas import tpu as pltpu


def _fused_kernel(xs_ref, wdiff_ref, bdiff_ref, out_ref, acc_ref):
    """One (batch-tile, lane-tile) grid step.

    xs_ref   : (2, BT, T) stacked inputs, [0]=input_1, [1]=input_2 (orig dtype)
    wdiff_ref: (1, T) f32, (w[0,c]-w[1,c]) / HW replicated over HW positions
    bdiff_ref: (1,) f32 in SMEM, b[0]-b[1]
    out_ref  : (BT, 2) f32 softmax probabilities
    acc_ref  : (BT, 1) f32 running partial sum of (logit0 - logit1)   [scratch]
    """
    k = pl.program_id(1)

    @pl.when(k == 0)
    def _init():
        acc_ref[...] = jnp.zeros_like(acc_ref)

    x1 = xs_ref[0].astype(jnp.float32)            # (BT, T)  cast in-kernel
    x2 = xs_ref[1].astype(jnp.float32)
    prod = (x2 - x1) * x2                         # VPU elementwise
    w = wdiff_ref[...]                            # (1, T), broadcasts over sublanes
    # classifier + mean folded into the HW reduction (no MXU)
    acc_ref[...] += jnp.sum(prod * w, axis=-1, keepdims=True)   # (BT, 1)

    @pl.when(k == pl.num_programs(1) - 1)
    def _finalize():
        z = acc_ref[...] + bdiff_ref[0]           # (BT, 1) == logit0 - logit1
        # 2-class softmax == sigmoid: p1 = 1/(1+e^z), p0 = 1-p1
        # (pl.reciprocal(..., approx=True) is possible; exact keeps 1e-5 tol)
        p1 = 1.0 / (1.0 + jnp.exp(z))
        p0 = 1.0 - p1
        out_ref[...] = jnp.concatenate([p0, p1], axis=-1).astype(out_ref.dtype)


def _pick_batch_tile(b):
    # Fill the 8 sublanes when B divides evenly; otherwise keep B whole
    # (a full-dim block is always layout-legal).
    return 8 if (b % 8 == 0) else b


def _pick_lane_tile(total, bytes_per_lane, max_block_bytes=4 * 1024 * 1024):
    """Largest multiple-of-128 divisor of `total` whose block fits the budget."""
    if total * bytes_per_lane <= max_block_bytes or total <= 128:
        return total
    t = min(total, (max_block_bytes // bytes_per_lane) // 128 * 128)
    while t >= 128:
        if total % t == 0:
            return t
        t -= 128
    return total  # fallback: single full-dim block


def change_detector_forward(input_1, input_2, clf_weight, clf_bias, *, lane_tile=None):
    """Forward pass of ChangeDetectorDoubleAttDyn5.

    input_1 / input_2 : (B, C, H, W), any float dtype (kept as-is in HBM)
    clf_weight        : (2, C)   clf_bias : (2,)
    returns           : (B, 2) f32 softmax probabilities
    """
    B, C, H, W = input_1.shape
    HW = H * W
    L = C * HW

    # One stacked operand: halves pipelined input buffers / DMA descriptors.
    xs = jnp.stack([input_1, input_2], axis=0).reshape(2, B, L)

    # Fold classifier weight difference and the 1/HW mean into one lane vector.
    w = clf_weight.astype(jnp.float32)
    wdiff = jnp.repeat((w[0] - w[1]) / jnp.float32(HW), HW).reshape(1, L)   # (1, C*HW)
    bdiff = (clf_bias[0] - clf_bias[1]).astype(jnp.float32).reshape(1)      # (1,) -> SMEM

    bt = _pick_batch_tile(B)
    if lane_tile is None:
        lane_tile = _pick_lane_tile(L, 2 * bt * xs.dtype.itemsize)
    assert L % lane_tile == 0, "lane_tile must divide C*H*W"
    nb, nk = B // bt, L // lane_tile

    grid_spec = pltpu.PrefetchScalarGridSpec(
        num_scalar_prefetch=0,
        grid=(nb, nk),
        in_specs=[
            pl.BlockSpec((2, bt, lane_tile), lambda i, k: (0, i, k)),
            pl.BlockSpec((1, lane_tile), lambda i, k: (0, k)),
            pl.BlockSpec(memory_space=pltpu.MemorySpace.SMEM),   # scalar bias diff
        ],
        out_specs=pl.BlockSpec((bt, 2), lambda i, k: (i, 0)),
        scratch_shapes=[pltpu.VMEM((bt, 1), jnp.float32)],
    )

    cost = pl.CostEstimate(
        flops=4 * B * L + 8 * B,
        transcendentals=B,
        bytes_accessed=int(xs.size * xs.dtype.itemsize + L * 4 + 4 + B * 2 * 4),
    )

    return pl.pallas_call(
        _fused_kernel,
        out_shape=jax.ShapeDtypeStruct((B, 2), jnp.float32),
        grid_spec=grid_spec,
        compiler_params=pltpu.CompilerParams(
            # batch axis is independent -> both TensorCores on v7x;
            # lane (reduction) axis carries the accumulator -> arbitrary.
            dimension_semantics=("parallel", "arbitrary"),
            # blocks are budgeted at ~4 MiB; 32 MiB scoped VMEM leaves ample
            # headroom on v5e/v6e (128 MiB physical) and v7x (64 MiB physical).
            vmem_limit_bytes=32 * 1024 * 1024,
        ),
        cost_estimate=cost,
    )(xs, wdiff, bdiff)


def reference_forward(input_1, input_2, clf_weight, clf_bias):
    diff = input_2 - input_1
    x = diff * input_2
    pooled = jnp.mean(x.astype(jnp.float32), axis=(2, 3))     # (B, C)
    logits = pooled @ clf_weight.T.astype(jnp.float32) + clf_bias.astype(jnp.float32)
    return jax.nn.softmax(logits, axis=1)


if __name__ == "__main__":
    # Module config: chn=8, final=4 -> final_channel=4; forward() expects C=4.
    chn, final_channel = 8, 4
    B, C, H, W = 2, final_channel, 16, 16

    key = jax.random.PRNGKey(0)
    k1, k2, kw, kb = jax.random.split(key, 4)
    input_1 = jax.random.normal(k1, (B, C, H, W), dtype=jnp.float32)
    input_2 = jax.random.normal(k2, (B, C, H, W), dtype=jnp.float32)

    bound = 1.0 / jnp.sqrt(jnp.float32(final_channel))
    clf_weight = jax.random.uniform(kw, (2, final_channel),
                                    minval=-bound, maxval=bound, dtype=jnp.float32)
    clf_bias = jax.random.uniform(kb, (2,), minval=-bound, maxval=bound,
                                  dtype=jnp.float32)

    ref = reference_forward(input_1, input_2, clf_weight, clf_bias)

    # 1) auto tile (single lane block at this toy size)
    out = jax.block_until_ready(
        change_detector_forward(input_1, input_2, clf_weight, clf_bias))
    assert out.shape == (B, 2)
    assert jnp.allclose(out, ref, atol=1e-5, rtol=1e-5), (out, ref)

    # 2) force a multi-step reduction grid to exercise the accumulator path
    out2 = jax.block_until_ready(
        change_detector_forward(input_1, input_2, clf_weight, clf_bias, lane_tile=256))
    assert jnp.allclose(out2, ref, atol=1e-5, rtol=1e-5), (out2, ref)

    # 3) bf16 inputs stay bf16 in HBM (halved DMA bytes); cast happens in-kernel
    i1_bf, i2_bf = input_1.astype(jnp.bfloat16), input_2.astype(jnp.bfloat16)
    out3 = jax.block_until_ready(
        change_detector_forward(i1_bf, i2_bf, clf_weight, clf_bias, lane_tile=512))
    ref3 = reference_forward(i1_bf.astype(jnp.float32), i2_bf.astype(jnp.float32),
                             clf_weight, clf_bias)
    assert jnp.allclose(out3, ref3, atol=1e-3, rtol=1e-3), (out3, ref3)

    print("KERNEL_OK")
</pallas_src>

<mosaic_0001>
module attributes {stable_mosaic.version = 11 : i64} {
  func.func @_fused_kernel(%arg0: i32, %arg1: i32, %arg2: memref<2x2x1024xf32, #tpu.memory_space<vmem>>, %arg3: memref<1x1024xf32, #tpu.memory_space<vmem>>, %arg4: memref<1xf32, #tpu.memory_space<smem>>, %arg5: memref<2x2xf32, #tpu.memory_space<vmem>>, %arg6: memref<2x1xf32, #tpu.memory_space<vmem>>) attributes {dimension_semantics = [#tpu.dimension_semantics<parallel>, #tpu.dimension_semantics<arbitrary>], iteration_bounds = array<i64: 1, 1>, scalar_prefetch = 0 : i64, scratch_operands = 1 : i64, tpu.core_type = #tpu.core_type<tc>, window_params = [{transform_indices = @transform_0, window_bounds = array<i64: 2, 2, 1024>}, {transform_indices = @transform_1, window_bounds = array<i64: 1, 1024>}, {transform_indices = @transform_2, window_bounds = array<i64: 1>}, {transform_indices = @transform_3, window_bounds = array<i64: 2, 2>}]} {
    %c0_i32 = arith.constant 0 : i32
    %0 = arith.cmpi eq, %arg1, %c0_i32 : i32
    %1 = arith.extui %0 : i1 to i32
    %c0_i32_0 = arith.constant 0 : i32
    %2 = arith.cmpi ne, %1, %c0_i32_0 : i32
    scf.if %2 {
      %cst_13 = arith.constant 0.000000e+00 : f32
      %20 = vector.broadcast %cst_13 : f32 to vector<2x1xf32>
      %c0_14 = arith.constant 0 : index
      %c0_15 = arith.constant 0 : index
      %21 = vector.load %arg6[%c0_14, %c0_15] : memref<2x1xf32, #tpu.memory_space<vmem>>, vector<2x1xf32>
      tpu.vector_store %arg6[%c0_14, %c0_15], %20 {strides = array<i32>} : memref<2x1xf32, #tpu.memory_space<vmem>>, vector<2x1xf32>,
    } else {
    }
    %c0 = arith.constant 0 : index
    %c0_1 = arith.constant 0 : index
    %c0_2 = arith.constant 0 : index
    %3 = vector.load %arg2[%c0, %c0_1, %c0_2] : memref<2x2x1024xf32, #tpu.memory_space<vmem>>, vector<1x2x1024xf32>
    %4 = vector.shape_cast %3 : vector<1x2x1024xf32> to vector<2x1024xf32>
    %c1 = arith.constant 1 : index
    %c0_3 = arith.constant 0 : index
    %c0_4 = arith.constant 0 : index
    %5 = vector.load %arg2[%c1, %c0_3, %c0_4] : memref<2x2x1024xf32, #tpu.memory_space<vmem>>, vector<1x2x1024xf32>
    %6 = vector.shape_cast %5 : vector<1x2x1024xf32> to vector<2x1024xf32>
    %7 = arith.subf %6, %4 : vector<2x1024xf32>
    %8 = arith.mulf %7, %6 : vector<2x1024xf32>
    %c0_5 = arith.constant 0 : index
    %c0_6 = arith.constant 0 : index
    %9 = vector.load %arg3[%c0_5, %c0_6] : memref<1x1024xf32, #tpu.memory_space<vmem>>, vector<1x1024xf32>
    %c0_7 = arith.constant 0 : index
    %c0_8 = arith.constant 0 : index
    %10 = vector.load %arg6[%c0_7, %c0_8] : memref<2x1xf32, #tpu.memory_space<vmem>>, vector<2x1xf32>
    %11 = vector.broadcast %9 : vector<1x1024xf32> to vector<2x1024xf32>
    %12 = arith.mulf %8, %11 : vector<2x1024xf32>
    %cst = arith.constant dense<0.000000e+00> : vector<2xf32>
    %13 = vector.multi_reduction <add>, %12, %cst [1] : vector<2x1024xf32> to vector<2xf32>
    %14 = vector.shape_cast %13 : vector<2xf32> to vector<2x1xf32>
    %15 = arith.addf %10, %14 : vector<2x1xf32>
    %c0_9 = arith.constant 0 : index
    %c0_10 = arith.constant 0 : index
    %16 = vector.load %arg6[%c0_9, %c0_10] : memref<2x1xf32, #tpu.memory_space<vmem>>, vector<2x1xf32>
    tpu.vector_store %arg6[%c0_9, %c0_10], %15 {strides = array<i32>} : memref<2x1xf32, #tpu.memory_space<vmem>>, vector<2x1xf32>,
    %c0_i32_11 = arith.constant 0 : i32
    %17 = arith.cmpi eq, %arg1, %c0_i32_11 : i32
    %18 = arith.extui %17 : i1 to i32
    %c0_i32_12 = arith.constant 0 : i32
    %19 = arith.cmpi ne, %18, %c0_i32_12 : i32
    scf.if %19 {
      %c0_13 = arith.constant 0 : index
      %c0_14 = arith.constant 0 : index
      %20 = vector.load %arg6[%c0_13, %c0_14] : memref<2x1xf32, #tpu.memory_space<vmem>>, vector<2x1xf32>
      %c0_15 = arith.constant 0 : index
      %21 = memref.load %arg4[%c0_15] : memref<1xf32, #tpu.memory_space<smem>>
      %22 = vector.broadcast %21 : f32 to vector<2x1xf32>
      %23 = arith.addf %20, %22 : vector<2x1xf32>
      %24 = math.exp %23 : vector<2x1xf32>
      %cst_16 = arith.constant 1.000000e+00 : f32
      %25 = vector.broadcast %cst_16 : f32 to vector<2x1xf32>
      %26 = arith.addf %25, %24 : vector<2x1xf32>
      %cst_17 = arith.constant 1.000000e+00 : f32
      %27 = vector.broadcast %cst_17 : f32 to vector<2x1xf32>
      %28 = arith.divf %27, %26 : vector<2x1xf32>
      %cst_18 = arith.constant 1.000000e+00 : f32
      %29 = vector.broadcast %cst_18 : f32 to vector<2x1xf32>
      %30 = arith.subf %29, %28 : vector<2x1xf32>
      %31 = tpu.concatenate %30, %28 in 1 : vector<2x1xf32>, vector<2x1xf32> -> vector<2x2xf32>
      %c0_19 = arith.constant 0 : index
      %c0_20 = arith.constant 0 : index
      %32 = vector.load %arg5[%c0_19, %c0_20] : memref<2x2xf32, #tpu.memory_space<vmem>>, vector<2x2xf32>
      tpu.vector_store %arg5[%c0_19, %c0_20], %31 {strides = array<i32>} : memref<2x2xf32, #tpu.memory_space<vmem>>, vector<2x2xf32>,
    } else {
    }
    return
  }
  func.func @transform_0(%arg0: i32, %arg1: i32) -> (i32, i32, i32) {
    %c0_i32 = arith.constant 0 : i32
    %c0_i32_0 = arith.constant 0 : i32
    return %c0_i32, %arg0, %arg1 : i32, i32, i32
  }
  func.func @transform_1(%arg0: i32, %arg1: i32) -> (i32, i32) {
    %c0_i32 = arith.constant 0 : i32
    %c0_i32_0 = arith.constant 0 : i32
    return %c0_i32, %arg1 : i32, i32
  }
  func.func @transform_2(%arg0: i32, %arg1: i32) -> i32 {
    %c0_i32 = arith.constant 0 : i32
    %c0_i32_0 = arith.constant 0 : i32
    return %c0_i32 : i32
  }
  func.func @transform_3(%arg0: i32, %arg1: i32) -> (i32, i32) {
    %c0_i32 = arith.constant 0 : i32
    %c0_i32_0 = arith.constant 0 : i32
    return %arg0, %c0_i32 : i32, i32
  }
}

</mosaic_0001>

<bundles_post_ra>
// kernel: tpu_custom_call.1
= control target key start
LH: loop header
LB: loop body
LE: loop exit
PB: predicated region body
PF: predicated region fallthrough
CT: control target
= control target key end

     0   :  { %9 = vsyncpa [#allocation5], 0  ;;  %s393_s0 = inlined_call_operand.hbm [shape: f32[2,2,1024], index: 0, kind: input, shape index: {}]   ;;  %s394_s1 = inlined_call_operand.hbm [shape: f32[1,1024], index: 1, kind: input, shape index: {}]   ;;  %s395_s2 = inlined_call_operand.<no memory space> [shape: f32[1], index: 2, kind: input, shape index: {}]   ;;  %s396_s3 = inlined_call_operand.hbm [shape: f32[2,2], index: 3, kind: output, shape index: {}]  }
   0x1   :  { %10 = vsyncpa [#allocation8], 0 }
   0x2   :  { %11 = vsyncpa [#allocation6], 0  ;;  %s316_s12 = smov [#allocation4]   ;;  %s244_s16 = scalar_lea.hbm %s393_s0, 512 }
   0x3   :  { %s17_s13 = sshll.u32 %s316_s12, 4  ;;  %p245_p0 = scmp.ne.s32.totalorder %s393_s0, %s244_s16  ;;  %s18_s13 = int_to_ptr.vmem [resolvable:$true] %s17_s13 }
   0x4   :  { %p248_p1 = scmp.lt.u32.totalorder %s244_s16, %s393_s0 }
   0x6   :  { %p250_p2 = pnand %p248_p1, %p245_p0 }
   0x8   :  { %253 = shalt.err (!%p250_p2)
}
   0x9   :  { %s254_s21 = scalar_lea.vmem %s18_s13, 512  ;;  %p259_p4 = scmp.lt.s32.totalorder %s18_s13, %s18_s13 }
   0xa   :  { %p255_p3 = scmp.ne.s32.totalorder %s18_s13, %s254_s21  ;;  %p260_p5 = scmp.lt.s32.totalorder %s254_s21, %s254_s21 }
   0xc   :  { %p261_p6 = por %p260_p5, %p259_p4 }
   0xe   :  { %p262_p7 = pnand %p261_p6, %p255_p3 }
  0x10   :  { %265 = shalt.err (!%p262_p7)
}
  0x11   :  { %s317_s22 = smov 256   ;;  %s318_s23 = smov 16  }
  0x12   :  { %23 = dma.hbm_to_vmem [thread:$0]  %s393_s0, 512, %s18_s13, [#allocation5], %s317_s22, %s317_s22, %s318_s23  }
  0x13   :  { %s319_s26 = smov [#allocation7]   ;;  %s266_s30 = scalar_lea.hbm %s394_s1, 128 }
  0x14   :  { %s30_s27 = sshll.u32 %s319_s26, 4  ;;  %p267_p8 = scmp.ne.s32.totalorder %s394_s1, %s266_s30  ;;  %s31_s27 = int_to_ptr.vmem [resolvable:$true] %s30_s27 }
  0x15   :  { %p270_p9 = scmp.lt.u32.totalorder %s266_s30, %s394_s1 }
  0x17   :  { %p272_p10 = pnand %p270_p9, %p267_p8 }
  0x19   :  { %275 = shalt.err (!%p272_p10)
}
  0x1a   :  { %s276_s8 = scalar_lea.vmem %s31_s27, 128  ;;  %p281_p12 = scmp.lt.s32.totalorder %s31_s27, %s31_s27 }
  0x1b   :  { %p277_p11 = scmp.ne.s32.totalorder %s31_s27, %s276_s8  ;;  %p282_p13 = scmp.lt.s32.totalorder %s276_s8, %s276_s8 }
  0x1d   :  { %p283_p0 = por %p282_p13, %p281_p12 }
  0x1f   :  { %p284_p1 = pnand %p283_p0, %p277_p11 }
  0x21   :  { %287 = shalt.err (!%p284_p1)
}
  0x22   :  { %33 = dma.hbm_to_vmem [thread:$0]  %s394_s1, 128, %s31_s27, [#allocation8]  }
  0x23   :  { %310 = dma.done.wait [#allocation5], 512  }
  0x24   :  { %311 = vsyncadd [#allocation5], 4294966784 }
  0x25   :  { %312 = dma.done.wait [#allocation8], 128  }
  0x26   :  { %313 = vsyncadd [#allocation8], 4294967168  ;;  %v60_v0 = vlaneseq  ;;  %vm46_vm0 = vcmask 1024   ;;  %v320_v1 = vmov 1983009808   ;;  %v321_v4 = vmov 0.0  }
  0x27   :  { %v95_v2 = vunpack.c.l.s4 %v320_v1  ;;  %47 = vst.msk [vmem:[#allocation2] sm:$0x3] %vm46_vm0, %v321_v4  ;;  %v48_v12 = vld [vmem:[#allocation4] sm:$0xff]  ;;  %v51_v13 = vld [vmem:[#allocation4 + $0x10] sm:$0xff]  ;;  %v49_v16 = vld [vmem:[#allocation4 + $0x8] sm:$0xff]  ;;  %vm174_vm1 = vcmask 1041408  }
  0x28   :  { %v61_v3 = vshrl.u32 %v60_v0, 7  ;;  %v52_v17 = vld [vmem:[#allocation4 + $0x18] sm:$0xff]  ;;  %v57_v18 = vld [vmem:[#allocation7] sm:$0xff]  ;;  %v53_v23 = vsub.f32 %v51_v13, %v48_v12  ;;  %s322_s11 = smov 1   ;;  %s323_s12 = smov [#allocation9]   ;;  %vm212_vm2 = vcmask 7168  }
  0x29   :  { %v96_v8 = vunpack.c.0.s8 %v95_v2  ;;  %v54_v27 = vsub.f32 %v52_v17, %v49_v16  ;;  %s222_s13 = sshll.u32 %s323_s12, 4  ;;  %vm214_vm3 = vcmask 9216   ;;  %s223_s13 = int_to_ptr.vmem [resolvable:$true] %s222_s13 }
  0x2a   :  { %v62_v5 = vsub.s32 0, %v61_v3  ;;  %v66_v6 = vsub.s32 1, %v61_v3  ;;  %v70_v7 = vsub.s32 2, %v61_v3  ;;  %v74_v9 = vsub.s32 3, %v61_v3  ;;  %p293_p3 = scmp.lt.s32.totalorder %s223_s13, %s223_s13 }
  0x2b   :  { %v78_v10 = vsub.s32 4, %v61_v3  ;;  %v82_v11 = vsub.s32 5, %v61_v3  ;;  %v86_v14 = vsub.s32 6, %v61_v3  ;;  %v90_v15 = vsub.s32 7, %v61_v3 }
  0x2c   :  { %v63_v19 = vrot.slane %v57_v18, %v62_v5  ;;  %v67_v20 = vrot.slane %v57_v18, %v66_v6  ;;  %v71_v21 = vrot.slane %v57_v18, %v70_v7  ;;  %v99_v22 = vsub.s32 %v96_v8, %v61_v3 }
  0x2d   :  { %v75_v24 = vrot.slane %v57_v18, %v74_v9  ;;  %v79_v25 = vrot.slane %v57_v18, %v78_v10  ;;  %v83_v26 = vrot.slane %v57_v18, %v82_v11  ;;  %v87_v28 = vrot.slane %v57_v18, %v86_v14 }
  0x2e   :  { %v91_v29 = vrot.slane %v57_v18, %v90_v15  ;;  %v92_v30 = vcombine.low %v63_v19, %v67_v20  ;;  %v55_v35 = vmul.f32 %v53_v23, %v51_v13  ;;  %v56_v38 = vmul.f32 %v54_v27, %v52_v17  ;;  %v58_v5 = vld [vmem:[#allocation2] sm:$0x3] }
  0x2f   :  { %v93_v31 = vcombine.low %v71_v21, %v75_v24  ;;  %v109_v32 = vcombine.low %v79_v25, %v83_v26  ;;  %v200_v8 = vstv %s395_s2  ;;  %s288_s2 = scalar_lea.vmem %s223_s13, 32 }
  0x30   :  { %v100_v33 = vrot.slane %v92_v30, %v99_v22  ;;  %v110_v34 = vcombine.low %v87_v28, %v91_v29  ;;  %p289_p2 = scmp.ne.s32.totalorder %s223_s13, %s288_s2  ;;  %p294_p4 = scmp.lt.s32.totalorder %s288_s2, %s288_s2 }
  0x31   :  { %v107_v36 = vrot.slane %v93_v31, %v99_v22  ;;  %v117_v37 = vrot.slane %v109_v32, %v99_v22 }
  0x32   :  { %v124_v39 = vrot.slane %v110_v34, %v99_v22  ;;  %p295_p5 = por %p294_p4, %p293_p3 }
  0x33   :  { %v108_v40 = vcombine.low %v100_v33, %v107_v36 }
  0x34   :  { %v125_v41 = vcombine.low %v117_v37, %v124_v39  ;;  %p296_p6 = pnand %p295_p5, %p289_p2 }
  0x35   :  { %v128_v42 = vmul.f32 %v108_v40, %v55_v35 }
  0x36   :  { %v129_v43 = vmul.f32 %v125_v41, %v56_v38 }
  0x37   :  { %v132_v44 = vcombine.high %v128_v42, %v128_v42  ;;  %v139_v45 = vrot.slane %v128_v42, %v99_v22 }
  0x38   :  { %v149_v46 = vcombine.high %v129_v43, %v129_v43  ;;  %v156_v49 = vrot.slane %v129_v43, %v99_v22 }
  0x39   :  { %v146_v47 = vrot.slane %v132_v44, %v99_v22  ;;  %v147_v48 = vcombine.high %v139_v45, %v139_v45  ;;  %v175_v50 = vsel %vm174_vm1, %v139_v45, 0.0 }
  0x3a   :  { %v163_v55 = vrot.slane %v149_v46, %v99_v22  ;;  %v164_v56 = vcombine.high %v156_v49, %v156_v49  ;;  %v182_v59 = vsel %vm174_vm1, %v156_v49, 0.0 }
  0x3b   :  { %v148_v51 = vcombine.high %v146_v47, %v146_v47  ;;  %v176_v52 = vsel %vm174_vm1, %v147_v48, 0.0  ;;  %v178_v53 = vsel %vm174_vm1, %v146_v47, 0.0 }
  0x3c   :  { %v177_v54 = vadd.f32 %v176_v52, %v175_v50  ;;  %v165_v61 = vcombine.high %v163_v55, %v163_v55  ;;  %v184_v62 = vsel %vm174_vm1, %v164_v56, 0.0  ;;  %v186_v0 = vsel %vm174_vm1, %v163_v55, 0.0 }
  0x3d   :  { %v180_v57 = vsel %vm174_vm1, %v148_v51, 0.0 }
  0x3e   :  { %v179_v58 = vadd.f32 %v178_v53, %v177_v54  ;;  %v188_v2 = vsel %vm174_vm1, %v165_v61, 0.0 }
  0x40   :  { %v181_v60 = vadd.f32 %v180_v57, %v179_v58 }
  0x42   :  { %v183_v63 = vadd.f32 %v182_v59, %v181_v60 }
  0x44   :  { %v185_v1 = vadd.f32 %v184_v62, %v183_v63 }
  0x46   :  { %v187_v3 = vadd.f32 %v186_v0, %v185_v1 }
  0x48   :  { %v189_v4 = vadd.f32 %v188_v2, %v187_v3 }
  0x4a   :  { %190 = vadd.xlane.f32.xlu0 %v189_v4 }
  0xd7   :  { %v191_v6 = vpop.xlane.xlu0 %190 }
  0xd8   :  { %v192_v7 = vadd.f32 %v191_v6, %v58_v5 }
  0xda   :  { %194 = vst.msk [vmem:[#allocation2] sm:$0x3] %vm46_vm0, %v192_v7 }
  0xe1   :  { %v198_v9 = vld [vmem:[#allocation2] sm:$0x3] }
  0xe2   :  { %v201_v10 = vadd.f32 %v200_v8, %v198_v9 }
  0xe4   :  { %v202_v11 = vmul.f32 1.442695, %v201_v10 }
  0xe6   :  { %240 = vpow2.f32 %v202_v11 }
  0xf0   :  { %v241_v12 = vpop.eup %240 }
  0xf1   :  { %v204_v13 = vadd.f32 1.0, %v241_v12 }
  0xf3   :  { %242 = vrcp.f32 %v204_v13 }
  0xfd   :  { %v243_v14 = vpop.eup %242 }
  0xfe   :  { %209 = vrot.lane.b32.xlu0 %v243_v14, %s322_s11  ;;  %v207_v15 = vsub.f32 1.0, %v243_v14 }
 0x170   :  { %v210_v16 = vpop.permute.xlu0 %209 }
 0x171   :  { %v213_v17 = vsel %vm212_vm2, %v207_v15, %v210_v16 }
 0x172   :  { %215 = vst.msk [vmem:[#allocation9] sm:$0x3] %vm214_vm3, %v213_v17 }
 0x173   :  { %299 = shalt.err (!%p296_p6)
}
 0x174   :  { %s300_s16 = scalar_lea.hbm %s396_s3, 32 }
 0x175   :  { %p301_p7 = scmp.ne.s32.totalorder %s396_s3, %s300_s16  ;;  %p304_p8 = scmp.lt.u32.totalorder %s300_s16, %s396_s3 }
 0x177   :  { %p306_p9 = pnand %p304_p8, %p301_p7 }
 0x179   :  { %309 = shalt.err (!%p306_p9)
}
 0x17a   :  { %225 = dma.vmem_to_hbm [thread:$0]  %s223_s13, 32, %s396_s3, [#allocation6]  }
 0x17b   :  { %314 = dma.done.wait [#allocation6], 32  }
 0x17c   :  { %315 = vsyncadd [#allocation6], 4294967264 }
 0x17d   :  { %229 = vsyncpa [#allocation5], 1 }
 0x17e   :  { %230 = vsyncpa [#allocation8], 1 }
 0x17f   :  { %231 = vsyncpa [#allocation6], 1 }

</bundles_post_ra>
